<compile_context>
chip_gen: v7x
topology: tpu7x:2x2x1
jax: 0.10.0
libtpu: 0.0.40
codegen_flags: <defaults>
</compile_context>

<pallas_src>
import jax
import jax.numpy as jnp
from jax.experimental import pallas as pl
from jax.experimental.pallas import tpu as pltpu

_LANE_CANDIDATES = (4096, 2048, 1024, 512, 256, 128)
_SMALL_SINGLE_BLOCK_BYTES = 1 << 20   # aligned arrays below this run as 1 block
_ODD_SINGLE_BLOCK_BYTES = 256 << 10   # non-128-multiple arrays below this too


def _relu_kernel(x_ref, o_ref):
    # One VPU max per vreg; scalar 0 avoids materialising a zero tile.
    o_ref[...] = jnp.maximum(x_ref[...], 0)


def _sublane(dtype) -> int:
    # 8 for 32-bit, 16 for bf16, 32 for int8 (native packed tile heights).
    return max(8, 32 // max(jnp.dtype(dtype).itemsize, 1))


def _chip_defaults():
    """(target_block_bytes, vmem_limit_bytes) tuned per TPU generation.

    All returned values are safe on every generation (worst case: 8 MiB
    blocks -> 4 live buffers = 32 MiB, under the 48 MiB limit, under the
    64 MiB per-TC physical VMEM of v7x).
    """
    kind = ""
    try:
        kind = jax.devices()[0].device_kind.lower()
    except Exception:  # pragma: no cover - be robust to odd runtimes
        pass
    if "v7" in kind:
        return 8 << 20, 48 << 20   # 64 MiB physical VMEM per TC, fast HBM
    if "v6" in kind:
        return 4 << 20, 64 << 20   # 128 MiB physical VMEM
    if "v5" in kind:
        return 4 << 20, 48 << 20   # 128 MiB physical VMEM, slower HBM
    return 4 << 20, 48 << 20       # unknown: conservative everywhere


def _relu_call_2d(x2d, block_rows, vmem_limit_bytes, donate):
    rows, lane = x2d.shape
    grid = (pl.cdiv(rows, block_rows),)
    return pl.pallas_call(
        _relu_kernel,
        out_shape=jax.ShapeDtypeStruct((rows, lane), x2d.dtype),
        grid_spec=pltpu.PrefetchScalarGridSpec(
            num_scalar_prefetch=0,
            grid=grid,
            in_specs=[pl.BlockSpec((block_rows, lane), lambda i: (i, 0))],
            out_specs=pl.BlockSpec((block_rows, lane), lambda i: (i, 0)),
        ),
        compiler_params=pltpu.CompilerParams(
            dimension_semantics=("parallel",),
            vmem_limit_bytes=vmem_limit_bytes,
        ),
        input_output_aliases={0: 0} if donate else {},
    )(x2d)


def _block_rows_for(rows, lane, dtype, target_block_bytes, total_bytes):
    """Fixed budget-sized block height; >= 2 grid steps for non-tiny arrays."""
    if total_bytes <= _SMALL_SINGLE_BLOCK_BYTES:
        # One block == whole array (full-extent dims are always a legal block).
        return rows
    itemsize = jnp.dtype(dtype).itemsize
    sub = _sublane(dtype)
    budget_rows = max(sub, (target_block_bytes // (lane * itemsize)) // sub * sub)
    # Cap at ~half the array so there are always >= 2 grid steps: DMAs
    # pipeline and the v7x megacore can shard the "parallel" axis.
    half_rows = max(sub, pl.cdiv(pl.cdiv(rows, 2), sub) * sub)
    return min(budget_rows, half_rows)


def relu_pallas(x: jax.Array, *, target_block_bytes: int | None = None,
                vmem_limit_bytes: int | None = None,
                donate: bool = False) -> jax.Array:
    """ReLU over an arbitrary-shaped array via a tiled Pallas TPU kernel."""
    orig_shape, dtype = x.shape, x.dtype
    n = x.size
    if n == 0:
        return x

    tb_default, vl_default = _chip_defaults()
    target_block_bytes = target_block_bytes or tb_default
    vmem_limit_bytes = vmem_limit_bytes or vl_default

    itemsize = jnp.dtype(dtype).itemsize
    total_bytes = n * itemsize

    if n % 128 == 0:
        # Exact lane-dense 2-D view: widest multiple-of-128 lane that divides n.
        lane = next(w for w in _LANE_CANDIDATES if n % w == 0)
        rows = n // lane
        block_rows = _block_rows_for(rows, lane, dtype, target_block_bytes,
                                     total_bytes)
        out2d = _relu_call_2d(x.reshape(rows, lane), block_rows,
                              vmem_limit_bytes, donate)
        return out2d.reshape(orig_shape)

    if total_bytes <= _ODD_SINGLE_BLOCK_BYTES:
        # Small, non-128-multiple size: a single full-array block (1, n) is
        # always a legal block shape; no pad, no slice.
        out2d = _relu_call_2d(x.reshape(1, n), 1, vmem_limit_bytes, donate)
        return out2d.reshape(orig_shape)

    # Rare fallback: large array whose element count is not a multiple of 128.
    # TODO(synk): replace pad+slice with a masked-tail kernel over the raw
    # buffer to avoid the extra HBM round trips on this (uncommon) path.
    lane = 128
    rows = pl.cdiv(n, lane)
    n_pad = rows * lane
    x_flat = jnp.pad(x.reshape(-1), (0, n_pad - n))  # 0 is ReLU's identity
    block_rows = _block_rows_for(rows, lane, dtype, target_block_bytes,
                                 n_pad * itemsize)
    out2d = _relu_call_2d(x_flat.reshape(rows, lane), block_rows,
                          vmem_limit_bytes, donate=False)
    return out2d.reshape(-1)[:n].reshape(orig_shape)


if __name__ == "__main__":
    key = jax.random.PRNGKey(0)

    # NCHW input, same convention as the PyTorch module (small demo shape).
    x = jax.random.normal(key, (2, 4, 16, 16), dtype=jnp.float32)
    out = jax.block_until_ready(relu_pallas(x))
    assert out.shape == x.shape and out.dtype == x.dtype
    assert jnp.array_equal(out, jnp.maximum(x, 0.0)), "Pallas ReLU mismatch"

    # Non-128-multiple element count -> single full-array block path (no pad).
    k1, k2 = jax.random.split(key)
    y = jax.random.normal(k1, (7, 33), dtype=jnp.float32)
    out_y = jax.block_until_ready(relu_pallas(y))
    assert jnp.array_equal(out_y, jnp.maximum(y, 0.0)), "odd-shape mismatch"

    # >1 MiB aligned input -> multi-step cdiv grid with a masked tail block.
    z = jax.random.normal(k2, (4, 4, 160, 160), dtype=jnp.float32)
    out_z = jax.block_until_ready(relu_pallas(z))
    assert jnp.array_equal(out_z, jnp.maximum(z, 0.0)), "tiled-path mismatch"

    print("KERNEL_OK")
</pallas_src>

<mosaic_0001>
module attributes {stable_mosaic.version = 11 : i64} {
  func.func @_relu_kernel(%arg0: i32, %arg1: memref<1x2048xf32, #tpu.memory_space<vmem>>, %arg2: memref<1x2048xf32, #tpu.memory_space<vmem>>) attributes {dimension_semantics = [#tpu.dimension_semantics<parallel>], iteration_bounds = array<i64: 1>, scalar_prefetch = 0 : i64, scratch_operands = 0 : i64, tpu.core_type = #tpu.core_type<tc>, window_params = [{transform_indices = @transform_0, window_bounds = array<i64: 1, 2048>}, {transform_indices = @transform_1, window_bounds = array<i64: 1, 2048>}]} {
    %c0 = arith.constant 0 : index
    %c0_0 = arith.constant 0 : index
    %0 = vector.load %arg1[%c0, %c0_0] : memref<1x2048xf32, #tpu.memory_space<vmem>>, vector<1x2048xf32>
    %cst = arith.constant 0.000000e+00 : f32
    %1 = vector.broadcast %cst : f32 to vector<1x2048xf32>
    %2 = arith.maximumf %0, %1 : vector<1x2048xf32>
    %c0_1 = arith.constant 0 : index
    %c0_2 = arith.constant 0 : index
    %3 = vector.load %arg2[%c0_1, %c0_2] : memref<1x2048xf32, #tpu.memory_space<vmem>>, vector<1x2048xf32>
    tpu.vector_store %arg2[%c0_1, %c0_2], %2 {strides = array<i32>} : memref<1x2048xf32, #tpu.memory_space<vmem>>, vector<1x2048xf32>,
    return
  }
  func.func @transform_0(%arg0: i32) -> (i32, i32) {
    %c0_i32 = arith.constant 0 : i32
    %c0_i32_0 = arith.constant 0 : i32
    return %arg0, %c0_i32 : i32, i32
  }
  func.func @transform_1(%arg0: i32) -> (i32, i32) {
    %c0_i32 = arith.constant 0 : i32
    %c0_i32_0 = arith.constant 0 : i32
    return %arg0, %c0_i32 : i32, i32
  }
}

</mosaic_0001>

<bundles_post_ra>
// kernel: tpu_custom_call.1
= control target key start
LH: loop header
LB: loop body
LE: loop exit
PB: predicated region body
PF: predicated region fallthrough
CT: control target
= control target key end

     0   :  { %6 = vsyncpa [#allocation3], 0  ;;  %s128_s0 = inlined_call_operand.hbm [shape: f32[1,2048], index: 0, kind: input, shape index: {}]   ;;  %s129_s1 = inlined_call_operand.hbm [shape: f32[1,2048], index: 1, kind: output, shape index: {}]  }
   0x1   :  { %7 = vsyncpa [#allocation4], 0  ;;  %s92_s6 = smov [#allocation2]   ;;  %s44_s10 = scalar_lea.hbm %s128_s0, 256 }
   0x2   :  { %s14_s7 = sshll.u32 %s92_s6, 4  ;;  %p45_p0 = scmp.ne.s32.totalorder %s128_s0, %s44_s10  ;;  %s15_s7 = int_to_ptr.vmem [resolvable:$true] %s14_s7 }
   0x3   :  { %p48_p1 = scmp.lt.u32.totalorder %s44_s10, %s128_s0 }
   0x5   :  { %p50_p2 = pnand %p48_p1, %p45_p0 }
   0x7   :  { %53 = shalt.err (!%p50_p2)
}
   0x8   :  { %s54_s15 = scalar_lea.vmem %s15_s7, 256  ;;  %p59_p4 = scmp.lt.s32.totalorder %s15_s7, %s15_s7 }
   0x9   :  { %p55_p3 = scmp.ne.s32.totalorder %s15_s7, %s54_s15  ;;  %p60_p5 = scmp.lt.s32.totalorder %s54_s15, %s54_s15 }
   0xb   :  { %p61_p6 = por %p60_p5, %p59_p4 }
   0xd   :  { %p62_p7 = pnand %p61_p6, %p55_p3 }
   0xf   :  { %65 = shalt.err (!%p62_p7)
}
  0x10   :  { %17 = dma.hbm_to_vmem [thread:$0]  %s128_s0, 256, %s15_s7, [#allocation3]  }
  0x11   :  { %88 = dma.done.wait [#allocation3], 256  }
  0x12   :  { %89 = vsyncadd [#allocation3], 4294967040  ;;  %s93_s18 = smov [#allocation5]   ;;  %v21_v0 = vld [vmem:[#allocation2] sm:$0xff]  ;;  %v22_v1 = vld [vmem:[#allocation2 + $0x8] sm:$0xff] }
  0x13   :  { %s33_s19 = sshll.u32 %s93_s18, 4  ;;  %v23_v2 = vmax.f32 %v21_v0, 0.0  ;;  %v24_v3 = vmax.f32 %v22_v1, 0.0  ;;  %s34_s19 = int_to_ptr.vmem [resolvable:$true] %s33_s19 }
  0x14   :  { %s66_s20 = scalar_lea.vmem %s34_s19, 256  ;;  %p71_p9 = scmp.lt.s32.totalorder %s34_s19, %s34_s19 }
  0x15   :  { %25 = vst [vmem:[#allocation5] sm:$0xff] %v23_v2  ;;  %26 = vst [vmem:[#allocation5 + $0x8] sm:$0xff] %v24_v3  ;;  %p67_p8 = scmp.ne.s32.totalorder %s34_s19, %s66_s20  ;;  %p72_p10 = scmp.lt.s32.totalorder %s66_s20, %s66_s20 }
  0x17   :  { %p73_p11 = por %p72_p10, %p71_p9 }
  0x19   :  { %p74_p12 = pnand %p73_p11, %p67_p8 }
  0x1b   :  { %77 = shalt.err (!%p74_p12)
}
  0x1c   :  { %s78_s22 = scalar_lea.hbm %s129_s1, 256 }
  0x1d   :  { %p79_p13 = scmp.ne.s32.totalorder %s129_s1, %s78_s22  ;;  %p82_p0 = scmp.lt.u32.totalorder %s78_s22, %s129_s1 }
  0x1f   :  { %p84_p1 = pnand %p82_p0, %p79_p13 }
  0x21   :  { %87 = shalt.err (!%p84_p1)
}
  0x22   :  { %36 = dma.vmem_to_hbm [thread:$0]  %s34_s19, 256, %s129_s1, [#allocation4]  }
  0x23   :  { %90 = dma.done.wait [#allocation4], 256  }
  0x24   :  { %91 = vsyncadd [#allocation4], 4294967040 }
  0x25   :  { %40 = vsyncpa [#allocation3], 1 }
  0x26   :  { %41 = vsyncpa [#allocation4], 1 }

</bundles_post_ra>
